<compile_context>
chip_gen: v6e
topology: v6e:2x2x1
jax: 0.10.0
libtpu: 0.0.40
codegen_flags: <defaults>
</compile_context>

<pallas_src>
import jax
import jax.numpy as jnp
from jax.experimental import pallas as pl
from jax.experimental.pallas import tpu as pltpu


def _ffn_kernel(x_ref, w1_ref, b1_ref, w2_ref, b2_ref, o_ref, acc_ref):
    # x_ref:  (TM, E)   row tile of the flattened (B*S, E) input (resident
    #                   across the inner F axis: its block index ignores kf)
    # w1_ref: (E, TF)   F-slice of W1        b1_ref: (1, TF)  f32
    # w2_ref: (TF, E)   F-slice of W2        b2_ref: (1, E)   f32
    # o_ref:  (TM, E)   output row tile
    # acc_ref:(TM, E)   f32 accumulator scratch (persists across kf steps)
    kf = pl.program_id(1)

    @pl.when(kf == 0)
    def _init():
        acc_ref[...] = jnp.zeros_like(acc_ref)

    # First matmul + bias + ReLU, all in f32; the (TM, TF) intermediate never
    # leaves VMEM.
    h = jnp.dot(x_ref[...], w1_ref[...], preferred_element_type=jnp.float32)
    h = jnp.maximum(h + b1_ref[...], 0.0)

    # Partial second matmul over this F-slice, accumulated in f32.
    acc_ref[...] += jnp.dot(h.astype(w2_ref.dtype), w2_ref[...],
                            preferred_element_type=jnp.float32)

    @pl.when(kf == pl.num_programs(1) - 1)
    def _store():
        o_ref[...] = (acc_ref[...] + b2_ref[...]).astype(o_ref.dtype)


def _pick_f_tile(F, max_tf):
    """Largest multiple-of-128 divisor of F that is <= max_tf (or F itself)."""
    if F <= max_tf:
        return F
    start = (min(max_tf, F) // 128) * 128
    for cand in range(start, 127, -128):
        if F % cand == 0:
            return cand
    # No lane-aligned divisor: fall back to the whole F (weights resident).
    return F


def position_wise_feed_forward(x, w1, b1, w2, b2, *,
                               max_tile_rows=256, max_f_tile=None):
    """x: (B, S, E); w1: (E, F); b1: (F,); w2: (F, E); b2: (E,) -> (B, S, E)."""
    B, S, E = x.shape
    E2, F = w1.shape
    assert E2 == E and w2.shape == (F, E) and b1.shape == (F,) and b2.shape == (E,)
    M = B * S

    dtype = x.dtype
    itemsize = jnp.dtype(dtype).itemsize

    x2 = x.reshape(M, E)                       # lane-dense (B*S, E) slab, no copy
    w1 = w1.astype(dtype)
    w2 = w2.astype(dtype)
    b1_2 = b1.reshape(1, F).astype(jnp.float32)   # biases stay f32 (review item)
    b2_2 = b2.reshape(1, E).astype(jnp.float32)

    # Row tile: 256 rows (MXU-friendly on v6e/v7x, bounds the f32 intermediate).
    TM = M if M <= max_tile_rows else max_tile_rows

    # F tile: bound each streamed weight slice to ~4 MiB of VMEM.
    if max_f_tile is None:
        max_f_tile = max(128, ((4 << 20) // max(1, E * itemsize)) // 128 * 128)
    TF = _pick_f_tile(F, max_f_tile)
    n_row = pl.cdiv(M, TM)
    n_f = F // TF

    # VMEM budget: double-buffered x/out/W1/W2 tiles + biases + f32 accumulator
    # + the (TM, TF) f32 intermediate. Capped at 60 MiB (legal on v7x's 64 MiB).
    need = (2 * TM * E * itemsize            # x tiles
            + 2 * TM * E * itemsize          # out tiles
            + 2 * E * TF * itemsize          # W1 tiles
            + 2 * TF * E * itemsize          # W2 tiles
            + 2 * TF * 4 + 2 * E * 4         # biases (f32)
            + TM * E * 4                     # accumulator scratch
            + TM * TF * 4)                   # ReLU intermediate
    vmem_limit = int(min(60 << 20, max(32 << 20, int(1.4 * need) + (2 << 20))))

    cost = pl.CostEstimate(
        flops=4 * M * E * F,                 # two MXU matmuls
        transcendentals=0,
        bytes_accessed=(2 * M * E * itemsize                    # x in + out
                        + n_row * 2 * E * F * itemsize          # weights per row tile
                        + n_row * (F + E) * 4),                 # biases
    )

    out2 = pl.pallas_call(
        _ffn_kernel,
        out_shape=jax.ShapeDtypeStruct((M, E), dtype),
        grid_spec=pltpu.PrefetchScalarGridSpec(
            num_scalar_prefetch=0,
            grid=(n_row, n_f),               # F (reduction) axis last
            in_specs=[
                pl.BlockSpec((TM, E), lambda i, kf: (i, 0)),    # x rows
                pl.BlockSpec((E, TF), lambda i, kf: (0, kf)),   # W1 slice
                pl.BlockSpec((1, TF), lambda i, kf: (0, kf)),   # b1 slice (f32)
                pl.BlockSpec((TF, E), lambda i, kf: (kf, 0)),   # W2 slice
                pl.BlockSpec((1, E), lambda i, kf: (0, 0)),     # b2 (f32)
            ],
            out_specs=pl.BlockSpec((TM, E), lambda i, kf: (i, 0)),
            scratch_shapes=[pltpu.VMEM((TM, E), jnp.float32)],
        ),
        compiler_params=pltpu.CompilerParams(
            dimension_semantics=("parallel", "arbitrary"),
            vmem_limit_bytes=vmem_limit,
        ),
        cost_estimate=cost,
    )(x2, w1, b1_2, w2, b2_2)

    return out2.reshape(B, S, E)


def _reference(x, w1, b1, w2, b2):
    h = jnp.maximum(x @ w1 + b1, 0.0)
    return h @ w2 + b2


if __name__ == "__main__":
    key = jax.random.PRNGKey(0)

    # --- Test 1: small shapes consistent with the module (single grid step) ---
    batch, seq, emb, d_ff = 2, 8, 32, 64
    kx, k1, kb1, k2, kb2, key = jax.random.split(key, 6)
    x = jax.random.normal(kx, (batch, seq, emb), dtype=jnp.float32)
    # Weights stored (in, out) (transposed vs. nn.Linear.weight) so the math is
    # x @ W1 + b1 -> relu -> @ W2 + b2, matching fc2(relu(fc1(x))).
    w1 = jax.random.normal(k1, (emb, d_ff), dtype=jnp.float32) * 0.1
    b1 = jax.random.normal(kb1, (d_ff,), dtype=jnp.float32) * 0.1
    w2 = jax.random.normal(k2, (d_ff, emb), dtype=jnp.float32) * 0.1
    b2 = jax.random.normal(kb2, (emb,), dtype=jnp.float32) * 0.1

    out = jax.block_until_ready(position_wise_feed_forward(x, w1, b1, w2, b2))
    ref = _reference(x, w1, b1, w2, b2)
    assert out.shape == (batch, seq, emb)
    assert jnp.allclose(out, ref, atol=1e-5, rtol=1e-5), "mismatch (small test)"

    # --- Test 2: exercises the tiled path (ragged row tiles + F accumulation) ---
    batch2, seq2, emb2, d_ff2 = 3, 200, 128, 1024   # M=600 -> 3 row tiles (ragged)
    kx, k1, kb1, k2, kb2, key = jax.random.split(key, 6)
    x2 = jax.random.normal(kx, (batch2, seq2, emb2), dtype=jnp.float32)
    w1b = jax.random.normal(k1, (emb2, d_ff2), dtype=jnp.float32) * 0.1
    b1b = jax.random.normal(kb1, (d_ff2,), dtype=jnp.float32) * 0.1
    w2b = jax.random.normal(k2, (d_ff2, emb2), dtype=jnp.float32) * 0.1
    b2b = jax.random.normal(kb2, (emb2,), dtype=jnp.float32) * 0.1

    out2 = jax.block_until_ready(
        position_wise_feed_forward(x2, w1b, b1b, w2b, b2b, max_f_tile=512))
    ref2 = _reference(x2, w1b, b1b, w2b, b2b)
    assert out2.shape == (batch2, seq2, emb2)
    assert jnp.allclose(out2, ref2, atol=1e-2, rtol=1e-2), "mismatch (tiled test)"

    print("KERNEL_OK")
</pallas_src>

<mosaic_0001>
module attributes {stable_mosaic.version = 11 : i64} {
  func.func @_ffn_kernel(%arg0: i32, %arg1: i32, %arg2: memref<16x32xf32, #tpu.memory_space<vmem>>, %arg3: memref<32x64xf32, #tpu.memory_space<vmem>>, %arg4: memref<1x64xf32, #tpu.memory_space<vmem>>, %arg5: memref<64x32xf32, #tpu.memory_space<vmem>>, %arg6: memref<1x32xf32, #tpu.memory_space<vmem>>, %arg7: memref<16x32xf32, #tpu.memory_space<vmem>>, %arg8: memref<16x32xf32, #tpu.memory_space<vmem>>) attributes {dimension_semantics = [#tpu.dimension_semantics<parallel>, #tpu.dimension_semantics<arbitrary>], iteration_bounds = array<i64: 1, 1>, scalar_prefetch = 0 : i64, scratch_operands = 1 : i64, tpu.core_type = #tpu.core_type<tc>, window_params = [{transform_indices = @transform_0, window_bounds = array<i64: 16, 32>}, {transform_indices = @transform_1, window_bounds = array<i64: 32, 64>}, {transform_indices = @transform_2, window_bounds = array<i64: 1, 64>}, {transform_indices = @transform_3, window_bounds = array<i64: 64, 32>}, {pipeline_mode = #tpu.pipeline_mode<synchronous>, transform_indices = @transform_4, window_bounds = array<i64: 1, 32>}, {transform_indices = @transform_5, window_bounds = array<i64: 16, 32>}]} {
    %c0_i32 = arith.constant 0 : i32
    %0 = arith.cmpi eq, %arg1, %c0_i32 : i32
    %1 = arith.extui %0 : i1 to i32
    %c0_i32_0 = arith.constant 0 : i32
    %2 = arith.cmpi ne, %1, %c0_i32_0 : i32
    scf.if %2 {
      %cst_16 = arith.constant 0.000000e+00 : f32
      %19 = vector.broadcast %cst_16 : f32 to vector<16x32xf32>
      %c0_17 = arith.constant 0 : index
      %c0_18 = arith.constant 0 : index
      %20 = vector.load %arg8[%c0_17, %c0_18] : memref<16x32xf32, #tpu.memory_space<vmem>>, vector<16x32xf32>
      tpu.vector_store %arg8[%c0_17, %c0_18], %19 {strides = array<i32>} : memref<16x32xf32, #tpu.memory_space<vmem>>, vector<16x32xf32>,
    } else {
    }
    %c0 = arith.constant 0 : index
    %c0_1 = arith.constant 0 : index
    %3 = vector.load %arg2[%c0, %c0_1] : memref<16x32xf32, #tpu.memory_space<vmem>>, vector<16x32xf32>
    %c0_2 = arith.constant 0 : index
    %c0_3 = arith.constant 0 : index
    %4 = vector.load %arg3[%c0_2, %c0_3] : memref<32x64xf32, #tpu.memory_space<vmem>>, vector<32x64xf32>
    %cst = arith.constant dense<0.000000e+00> : vector<16x64xf32>
    %5 = tpu.matmul %3, %4, %cst {dimension_numbers = #tpu.dot_dimension_numbers<[1], [0], [0], [1], [0, 0, 1, 1], [], []>} : vector<16x32xf32>, vector<32x64xf32>, vector<16x64xf32> -> vector<16x64xf32>
    %c0_4 = arith.constant 0 : index
    %c0_5 = arith.constant 0 : index
    %6 = vector.load %arg4[%c0_4, %c0_5] : memref<1x64xf32, #tpu.memory_space<vmem>>, vector<1x64xf32>
    %7 = vector.broadcast %6 : vector<1x64xf32> to vector<16x64xf32>
    %8 = arith.addf %5, %7 : vector<16x64xf32>
    %cst_6 = arith.constant 0.000000e+00 : f32
    %9 = vector.broadcast %cst_6 : f32 to vector<16x64xf32>
    %10 = arith.maximumf %8, %9 : vector<16x64xf32>
    %c0_7 = arith.constant 0 : index
    %c0_8 = arith.constant 0 : index
    %11 = vector.load %arg8[%c0_7, %c0_8] : memref<16x32xf32, #tpu.memory_space<vmem>>, vector<16x32xf32>
    %c0_9 = arith.constant 0 : index
    %c0_10 = arith.constant 0 : index
    %12 = vector.load %arg5[%c0_9, %c0_10] : memref<64x32xf32, #tpu.memory_space<vmem>>, vector<64x32xf32>
    %cst_11 = arith.constant dense<0.000000e+00> : vector<16x32xf32>
    %13 = tpu.matmul %10, %12, %cst_11 {dimension_numbers = #tpu.dot_dimension_numbers<[1], [0], [0], [1], [0, 0, 1, 1], [], []>} : vector<16x64xf32>, vector<64x32xf32>, vector<16x32xf32> -> vector<16x32xf32>
    %14 = arith.addf %11, %13 : vector<16x32xf32>
    %c0_12 = arith.constant 0 : index
    %c0_13 = arith.constant 0 : index
    %15 = vector.load %arg8[%c0_12, %c0_13] : memref<16x32xf32, #tpu.memory_space<vmem>>, vector<16x32xf32>
    tpu.vector_store %arg8[%c0_12, %c0_13], %14 {strides = array<i32>} : memref<16x32xf32, #tpu.memory_space<vmem>>, vector<16x32xf32>,
    %c0_i32_14 = arith.constant 0 : i32
    %16 = arith.cmpi eq, %arg1, %c0_i32_14 : i32
    %17 = arith.extui %16 : i1 to i32
    %c0_i32_15 = arith.constant 0 : i32
    %18 = arith.cmpi ne, %17, %c0_i32_15 : i32
    scf.if %18 {
      %c0_16 = arith.constant 0 : index
      %c0_17 = arith.constant 0 : index
      %19 = vector.load %arg8[%c0_16, %c0_17] : memref<16x32xf32, #tpu.memory_space<vmem>>, vector<16x32xf32>
      %c0_18 = arith.constant 0 : index
      %c0_19 = arith.constant 0 : index
      %20 = vector.load %arg6[%c0_18, %c0_19] : memref<1x32xf32, #tpu.memory_space<vmem>>, vector<1x32xf32>
      %21 = vector.broadcast %20 : vector<1x32xf32> to vector<16x32xf32>
      %22 = arith.addf %19, %21 : vector<16x32xf32>
      %c0_20 = arith.constant 0 : index
      %c0_21 = arith.constant 0 : index
      %23 = vector.load %arg7[%c0_20, %c0_21] : memref<16x32xf32, #tpu.memory_space<vmem>>, vector<16x32xf32>
      tpu.vector_store %arg7[%c0_20, %c0_21], %22 {strides = array<i32>} : memref<16x32xf32, #tpu.memory_space<vmem>>, vector<16x32xf32>,
    } else {
    }
    return
  }
  func.func @transform_0(%arg0: i32, %arg1: i32) -> (i32, i32) {
    %c0_i32 = arith.constant 0 : i32
    %c0_i32_0 = arith.constant 0 : i32
    return %arg0, %c0_i32 : i32, i32
  }
  func.func @transform_1(%arg0: i32, %arg1: i32) -> (i32, i32) {
    %c0_i32 = arith.constant 0 : i32
    %c0_i32_0 = arith.constant 0 : i32
    return %c0_i32, %arg1 : i32, i32
  }
  func.func @transform_2(%arg0: i32, %arg1: i32) -> (i32, i32) {
    %c0_i32 = arith.constant 0 : i32
    %c0_i32_0 = arith.constant 0 : i32
    return %c0_i32, %arg1 : i32, i32
  }
  func.func @transform_3(%arg0: i32, %arg1: i32) -> (i32, i32) {
    %c0_i32 = arith.constant 0 : i32
    %c0_i32_0 = arith.constant 0 : i32
    return %arg1, %c0_i32 : i32, i32
  }
  func.func @transform_4(%arg0: i32, %arg1: i32) -> (i32, i32) {
    %c0_i32 = arith.constant 0 : i32
    %c0_i32_0 = arith.constant 0 : i32
    %c0_i32_1 = arith.constant 0 : i32
    return %c0_i32, %c0_i32_0 : i32, i32
  }
  func.func @transform_5(%arg0: i32, %arg1: i32) -> (i32, i32) {
    %c0_i32 = arith.constant 0 : i32
    %c0_i32_0 = arith.constant 0 : i32
    return %arg0, %c0_i32 : i32, i32
  }
}

</mosaic_0001>

<bundles_post_ra>
// kernel: tpu_custom_call.1
= control target key start
LH: loop header
LB: loop body
LE: loop exit
PB: predicated region body
PF: predicated region fallthrough
CT: control target
= control target key end

     0   :  { %vm25_vm0 = vcmask 261120   ;;  %s424_s0 = inlined_call_operand.vmem [shape: f32[16,32], index: 0, kind: input, shape index: {}]   ;;  %s425_s1 = inlined_call_operand.vmem [shape: f32[32,64], index: 1, kind: input, shape index: {}]   ;;  %s426_s2 = inlined_call_operand.vmem [shape: f32[1,64], index: 2, kind: input, shape index: {}]   ;;  %s427_s3 = inlined_call_operand.vmem [shape: f32[64,32], index: 3, kind: input, shape index: {}]   ;;  %s428_s4 = inlined_call_operand.vmem [shape: f32[1,32], index: 4, kind: input, shape index: {}]   ;;  %s429_s5 = inlined_call_operand.hbm [shape: f32[16,32], index: 5, kind: output, shape index: {}]  }
   0x1   :  { %v33_v0 = vld [vmem:[%s425_s1 + $0x18] sm:$0xff]  ;;  %v32_v1 = vld [vmem:[%s425_s1 + $0x10] sm:$0xff]  ;;  %v28_v2 = vld [vmem:[%s424_s0] sm:$0xff] }
   0x2   :  { %275 = vmatprep.subr.mxu0 %v33_v0  ;;  %v31_v3 = vld [vmem:[%s425_s1 + $0x8] sm:$0xff]  ;;  %283 = vmatprep.mubr.msk.f32.mxu0 %vm25_vm0, %v28_v2  ;;  %v134_v4 = vld [vmem:[%s427_s3 + $0x38] sm:$0xff]  ;;  %v133_v5 = vld [vmem:[%s427_s3 + $0x30] sm:$0xff] }
   0x3   :  { %276 = vmatpush3.msra.mxu0 %v33_v0  ;;  %286 = vmatprep.subr.mxu1 %v134_v4 }
   0x4   :  { %277 = vmatprep.subr.mxu0 %v32_v1 }
   0x5   :  { %10 = vsyncpa [#allocation4], 0  ;;  %278 = vmatpush3.msra.mxu0 %v32_v1  ;;  %v30_v6 = vld [vmem:[%s425_s1] sm:$0xff]  ;;  %287 = vmatpush3.msra.mxu1 %v134_v4  ;;  %v132_v7 = vld [vmem:[%s427_s3 + $0x28] sm:$0xff]  ;;  %v331_v14 = vmov 0.0   ;;  %vm135_vm1 = vcmask 523264  }
   0x6   :  { %279 = vmatprep.subr.mxu0 %v31_v3  ;;  %288 = vmatprep.subr.mxu1 %v133_v5  ;;  %v29_v8 = vld [vmem:[%s424_s0 + $0x8] sm:$0xff]  ;;  %v131_v9 = vld [vmem:[%s427_s3 + $0x20] sm:$0xff]  ;;  %v130_v10 = vld [vmem:[%s427_s3 + $0x18] sm:$0xff]  ;;  %27 = vst.msk [vmem:[#allocation2 + $0x8] sm:$0xff] %vm25_vm0, %v331_v14  ;;  %s332_s21 = smov [#allocation3]  }
   0x7   :  { %280 = vmatpush3.msra.mxu0 %v31_v3  ;;  %289 = vmatpush3.msra.mxu1 %v133_v5  ;;  %v129_v11 = vld [vmem:[%s427_s3 + $0x10] sm:$0xff]  ;;  %v128_v12 = vld [vmem:[%s427_s3 + $0x8] sm:$0xff]  ;;  %v127_v13 = vld [vmem:[%s427_s3] sm:$0xff]  ;;  %26 = vst.msk [vmem:[#allocation2] sm:$0xff] %vm25_vm0, %v331_v14  ;;  %s242_s22 = sshll.u32 %s332_s21, 4  ;;  %s243_s22 = int_to_ptr.vmem [resolvable:$true] %s242_s22 }
   0x8   :  { %281 = vmatprep.subr.mxu0 %v30_v6  ;;  %290 = vmatprep.subr.mxu1 %v132_v7  ;;  %v253_v15 = vld [vmem:[%s426_s2] ss:$0 sm:$0xff]  ;;  %s309_s23 = scalar_lea.vmem %s243_s22, 256  ;;  %p314_p1 = scmp.lt.s32.totalorder %s243_s22, %s243_s22 }
   0x9   :  { %282 = vmatpush3.msra.mxu0 %v30_v6  ;;  %291 = vmatpush3.msra.mxu1 %v132_v7  ;;  %v258_v28 = vld [vmem:[%s428_s4] ss:$0 sm:$0xff]  ;;  %p310_p0 = scmp.ne.s32.totalorder %s243_s22, %s309_s23  ;;  %p315_p2 = scmp.lt.s32.totalorder %s309_s23, %s309_s23 }
   0xa   :  { %284 = vmatmul.mubr.msk.f32.vlgmr.msra.gmra.mxu0 %vm25_vm0, %v29_v8  ;;  %292 = vmatprep.subr.mxu1 %v131_v9 }
   0xb   :  { %293 = vmatpush3.msra.mxu1 %v131_v9  ;;  %p316_p3 = por %p315_p2, %p314_p1 }
   0xc   :  { %294 = vmatprep.subr.mxu1 %v130_v10 }
   0xd   :  { %295 = vmatpush3.msra.mxu1 %v130_v10  ;;  %v126_v22 = vld [vmem:[#allocation2 + $0x8] sm:$0xff]  ;;  %p317_p4 = pnand %p316_p3, %p310_p0 }
   0xe   :  { %296 = vmatprep.subr.mxu1 %v129_v11  ;;  %v125_v24 = vld [vmem:[#allocation2] sm:$0xff] }
   0xf   :  { %297 = vmatpush3.msra.mxu1 %v129_v11 }
  0x10   :  { %298 = vmatprep.subr.mxu1 %v128_v12 }
  0x11   :  { %299 = vmatpush3.msra.mxu1 %v128_v12 }
  0x12   :  { %300 = vmatprep.subr.mxu1 %v127_v13 }
  0x13   :  { %301 = vmatpush3.msra.mxu1 %v127_v13 }
  0xca   :  { %v285_v16 = vpop.f32.mrf.mxu0 }
  0xcb   :  { %v120_v17 = vadd.f32 %v285_v16, %v253_v15 }
  0xcc   :  { %v114_v18 = vpop.f32.mrf.mxu0 }
  0xcd   :  { %v115_v19 = vadd.f32 %v253_v15, %v114_v18  ;;  %v124_v21 = vmax.f32 %v120_v17, 0.0 }
  0xcf   :  { %v123_v20 = vmax.f32 %v115_v19, 0.0 }
  0xd1   :  { %302 = vmatprep.mubr.msk.f32.mxu1 %vm135_vm1, %v123_v20 }
  0xd2   :  { %303 = vmatmul.mubr.msk.f32.vlgmr.msra.gmra.mxu1 %vm135_vm1, %v124_v21 }
 0x192   :  { %v304_v23 = vpop.f32.mrf.mxu1 }
 0x193   :  { %v218_v25 = vadd.f32 %v304_v23, %v126_v22 }
 0x194   :  { %v208_v26 = vpop.f32.mrf.mxu1 }
 0x195   :  { %220 = vst.msk [vmem:[#allocation2 + $0x8] sm:$0xff] %vm25_vm0, %v218_v25  ;;  %v217_v27 = vadd.f32 %v208_v26, %v125_v24 }
 0x197   :  { %219 = vst.msk [vmem:[#allocation2] sm:$0xff] %vm25_vm0, %v217_v27 }
 0x19c   :  { %v225_v29 = vld [vmem:[#allocation2 + $0x8] sm:$0xff] }
 0x19d   :  { %v234_v30 = vadd.f32 %v258_v28, %v225_v29 }
 0x19e   :  { %v224_v31 = vld [vmem:[#allocation2] sm:$0xff] }
 0x19f   :  { %v233_v32 = vadd.f32 %v258_v28, %v224_v31  ;;  %236 = vst.msk [vmem:[#allocation3 + $0x8] sm:$0xff] %vm25_vm0, %v234_v30 }
 0x1a1   :  { %235 = vst.msk [vmem:[#allocation3] sm:$0xff] %vm25_vm0, %v233_v32 }
 0x1a2   :  { %320 = shalt.err (!%p317_p4)
}
 0x1a3   :  { %s333_s24 = smov 128   ;;  %s334_s4 = smov 8  }
 0x1a4   :  { %248 = dma.vmem_to_hbm [thread:$0]  %s243_s22, 256, %s429_s5, [#allocation4], %s333_s24, %s333_s24, %s334_s4  }
 0x1a5   :  { %329 = dma.done.wait [#allocation4], 256  }
 0x1a6   :  { %330 = vsyncadd [#allocation4], 4294967040 }
 0x1a7   :  { %252 = vsyncpa [#allocation4], 1 }

</bundles_post_ra>
